<compile_context>
chip_gen: v7x
topology: tpu7x:2x2x1
jax: 0.10.0
libtpu: 0.0.40
codegen_flags: <defaults>
</compile_context>

<pallas_src>
import functools

import jax
import jax.numpy as jnp
from jax import lax
from jax.experimental import pallas as pl
from jax.experimental.pallas import tpu as pltpu


def _bottleneck_kernel(H, x_ref, w1_ref, w2_ref, w3_ref, bnm_ref, bno_ref, out_ref):
    # Layout: rows = (image, h), lanes = w*C + c (lane-dense).
    # x_ref  : (R, W*Cin)          f32   one group of whole images
    # w1_ref : (W*Cin, W*Cmid)     bf16  conv1 as block-diagonal kron(I_W, w1)
    # w2_ref : (3, W*Cmid, W*Cmid) bf16  conv2 banded matrices, leading dim = kernel row
    # w3_ref : (W*Cmid, W*Cout)    bf16  conv3 as block-diagonal kron(I_W, w3)
    # bnm_ref: (4, W*Cmid)         f32   [scale1, bias1, scale2, bias2] tiled over w
    # bno_ref: (2, W*Cout)         f32   [scale3, bias3] tiled over w
    # out_ref: (R, W*Cout)         f32   final block output (Cout == Cin)
    x = x_ref[...]                                   # loaded once; reused for residual
    R = x.shape[0]

    # conv1 (1x1) -> bn1 -> relu : one lane-dense GEMM on the MXU.
    y1 = jnp.dot(x.astype(jnp.bfloat16), w1_ref[...],
                 preferred_element_type=jnp.float32)
    y1 = jnp.maximum(y1 * bnm_ref[0:1, :] + bnm_ref[1:2, :], 0.0)   # (R, W*Cmid) f32

    # conv2 (3x3, pad 1) -> bn2 -> relu.
    # kx shifts + cin->cout mixing (incl. w-boundary zero padding) live in the banded
    # weights; only the ky (h) shifts are in-kernel: two sublane rolls + per-image
    # h-boundary masks (also cover the roll wrapping across images / block edges).
    h = lax.broadcasted_iota(jnp.int32, (R, 1), 0) % H
    up = jnp.where(h > 0, pltpu.roll(y1, 1, axis=0), 0.0)        # row h-1 (kernel row 0)
    dn = jnp.where(h < H - 1, pltpu.roll(y1, R - 1, axis=0), 0.0)  # roll by -1: row h+1
    y2 = (jnp.dot(up.astype(jnp.bfloat16), w2_ref[0], preferred_element_type=jnp.float32)
          + jnp.dot(y1.astype(jnp.bfloat16), w2_ref[1], preferred_element_type=jnp.float32)
          + jnp.dot(dn.astype(jnp.bfloat16), w2_ref[2], preferred_element_type=jnp.float32))
    y2 = jnp.maximum(y2 * bnm_ref[2:3, :] + bnm_ref[3:4, :], 0.0)   # (R, W*Cmid) f32

    # conv3 (1x1) -> bn3 -> + identity -> relu ; lane-dense unmasked store.
    y3 = jnp.dot(y2.astype(jnp.bfloat16), w3_ref[...],
                 preferred_element_type=jnp.float32)                # (R, W*Cout) f32
    out_ref[...] = jnp.maximum(y3 * bno_ref[0:1, :] + bno_ref[1:2, :] + x, 0.0)


def bottleneck_pallas(x_nchw, w1_oihw, w2_oihw, w3_oihw, bn1, bn2, bn3, eps=1e-5):
    """Fused Bottleneck forward (stride=1, downsample=None). x_nchw: (B, Cin, H, W) f32."""
    B, Cin, H, W = x_nchw.shape
    Cmid = w1_oihw.shape[0]
    Cout = w3_oihw.shape[0]
    if Cout != Cin or Cin != 4 * Cmid:
        raise ValueError(
            "Bottleneck with stride=1 / downsample=None needs in_channel == 4*out_channel")

    f32, bf16 = jnp.float32, jnp.bfloat16

    # Lane-dense layout: rows = (b, h), lanes = w*C + c.  Batch is folded into M.
    x2d = jnp.transpose(x_nchw, (0, 2, 3, 1)).reshape(B * H, W * Cin).astype(f32)

    # conv1 / conv3 (1x1) as block-diagonal GEMMs over the w*C lane axis.
    w1_mat = jnp.transpose(w1_oihw[:, :, 0, 0], (1, 0)).astype(f32)     # (Cin, Cmid)
    w3_mat = jnp.transpose(w3_oihw[:, :, 0, 0], (1, 0)).astype(f32)     # (Cmid, Cout)
    eye_w = jnp.eye(W, dtype=f32)
    w1bd = jnp.kron(eye_w, w1_mat).astype(bf16)                         # (W*Cin, W*Cmid)
    w3bd = jnp.kron(eye_w, w3_mat).astype(bf16)                         # (W*Cmid, W*Cout)

    # conv2 (3x3) as 3 banded matrices (one per kernel row i); the kx shift and the
    # zero padding at w=0 / w=W-1 are encoded in the band (shifted identity) structure:
    #   M_i[w_in*Cmid+cin, w_out*Cmid+cout] = w2[cout, cin, i, (w_in - w_out) + 1]
    mats = []
    for i in range(3):
        acc = jnp.zeros((W * Cmid, W * Cmid), f32)
        for j in range(3):
            band = jnp.eye(W, k=1 - j, dtype=f32)                       # w_in = w_out + (j-1)
            acc = acc + jnp.kron(band, jnp.transpose(w2_oihw[:, :, i, j], (1, 0)).astype(f32))
        mats.append(acc)
    w2b = jnp.stack(mats, axis=0).astype(bf16)                          # (3, W*Cmid, W*Cmid)

    # Fold BatchNorm (inference stats) into per-channel scale/bias, tiled over w.
    def fold_bn(p):
        gamma, beta, mean, var = p
        scale = gamma / jnp.sqrt(var + eps)
        return scale, beta - mean * scale

    s1, b1 = fold_bn(bn1)
    s2, b2 = fold_bn(bn2)
    s3, b3 = fold_bn(bn3)
    bnm = jnp.stack([jnp.tile(s1, W), jnp.tile(b1, W),
                     jnp.tile(s2, W), jnp.tile(b2, W)], axis=0).astype(f32)   # (4, W*Cmid)
    bno = jnp.stack([jnp.tile(s3, W), jnp.tile(b3, W)], axis=0).astype(f32)   # (2, W*Cout)

    # Grid over groups of whole images: >=2 parallel steps when possible so v7x's second
    # TensorCore gets work; a single larger step otherwise (more M per GEMM).
    if B >= 2 and B % 2 == 0 and ((B // 2) * H) % 8 == 0:
        G = 2
    else:
        G = 1
    rows_per_step = (B // G) * H

    kernel = functools.partial(_bottleneck_kernel, H)

    out2d = pl.pallas_call(
        kernel,
        out_shape=jax.ShapeDtypeStruct((B * H, W * Cout), f32),
        grid=(G,),
        in_specs=[
            pl.BlockSpec((rows_per_step, W * Cin), lambda g: (g, 0)),     # x (lane-dense)
            pl.BlockSpec((W * Cin, W * Cmid), lambda g: (0, 0)),          # conv1 block-diag
            pl.BlockSpec((3, W * Cmid, W * Cmid), lambda g: (0, 0, 0)),   # conv2 banded
            pl.BlockSpec((W * Cmid, W * Cout), lambda g: (0, 0)),         # conv3 block-diag
            pl.BlockSpec((4, W * Cmid), lambda g: (0, 0)),                # folded bn1/bn2
            pl.BlockSpec((2, W * Cout), lambda g: (0, 0)),                # folded bn3
        ],
        out_specs=pl.BlockSpec((rows_per_step, W * Cout), lambda g: (g, 0)),
        compiler_params=pltpu.CompilerParams(
            dimension_semantics=("parallel",)),
    )(x2d, w1bd, w2b, w3bd, bnm, bno)

    return jnp.transpose(out2d.reshape(B, H, W, Cout), (0, 3, 1, 2))      # back to NCHW


def bottleneck_ref(x, w1, w2, w3, bn1, bn2, bn3, eps=1e-5):
    """Pure-JAX f32 reference matching the PyTorch forward (stride=1, downsample=None, eval BN)."""
    def conv(y, w, pad):
        return lax.conv_general_dilated(
            y, w, window_strides=(1, 1), padding=((pad, pad), (pad, pad)),
            dimension_numbers=("NCHW", "OIHW", "NCHW"))

    def bn(y, p):
        gamma, beta, mean, var = p
        inv = gamma / jnp.sqrt(var + eps)
        return (y - mean[None, :, None, None]) * inv[None, :, None, None] \
            + beta[None, :, None, None]

    out = jax.nn.relu(bn(conv(x, w1, 0), bn1))
    out = jax.nn.relu(bn(conv(out, w2, 1), bn2))
    out = bn(conv(out, w3, 0), bn3) + x
    return jax.nn.relu(out)


if __name__ == "__main__":
    key = jax.random.PRNGKey(0)
    B, Cmid, H, W = 2, 4, 16, 16          # out_channel = 4
    Cin = Cout = 4 * Cmid                  # expansion = 4; residual needs Cin == 4*Cmid
    ks = jax.random.split(key, 7)

    x = jax.random.normal(ks[0], (B, Cin, H, W), dtype=jnp.float32)
    w1 = jax.random.normal(ks[1], (Cmid, Cin, 1, 1), dtype=jnp.float32) * 0.2
    w2 = jax.random.normal(ks[2], (Cmid, Cmid, 3, 3), dtype=jnp.float32) * 0.2
    w3 = jax.random.normal(ks[3], (Cout, Cmid, 1, 1), dtype=jnp.float32) * 0.2

    def rand_bn(k, c):
        k1, k2, k3, k4 = jax.random.split(k, 4)
        return (jax.random.uniform(k1, (c,), minval=0.5, maxval=1.5),
                jax.random.normal(k2, (c,)) * 0.1,
                jax.random.normal(k3, (c,)) * 0.1,
                jax.random.uniform(k4, (c,), minval=0.5, maxval=1.5))

    bn1 = rand_bn(ks[4], Cmid)
    bn2 = rand_bn(ks[5], Cmid)
    bn3 = rand_bn(ks[6], Cout)

    out = jax.block_until_ready(bottleneck_pallas(x, w1, w2, w3, bn1, bn2, bn3))
    ref = jax.block_until_ready(bottleneck_ref(x, w1, w2, w3, bn1, bn2, bn3))

    assert out.shape == ref.shape == (B, Cin, H, W)
    max_err = float(jnp.max(jnp.abs(out - ref)))
    scale = float(jnp.max(jnp.abs(ref)))
    # Matmul operands are bf16 (f32 accumulate), so size the tolerance for bf16 rounding;
    # any structural bug (wrong band/roll direction) produces errors of order `scale`.
    assert max_err <= 3e-2 * scale + 3e-2, f"mismatch vs reference: max abs err = {max_err}"
    print("KERNEL_OK")
</pallas_src>

<mosaic_0001>
module attributes {stable_mosaic.version = 11 : i64} {
  func.func @_bottleneck_kernel(%arg0: i32, %arg1: memref<16x256xf32, #tpu.memory_space<vmem>>, %arg2: memref<256x64xbf16, #tpu.memory_space<vmem>>, %arg3: memref<3x64x64xbf16, #tpu.memory_space<vmem>>, %arg4: memref<64x256xbf16, #tpu.memory_space<vmem>>, %arg5: memref<4x64xf32, #tpu.memory_space<vmem>>, %arg6: memref<2x256xf32, #tpu.memory_space<vmem>>, %arg7: memref<16x256xf32, #tpu.memory_space<vmem>>) attributes {dimension_semantics = [#tpu.dimension_semantics<parallel>], iteration_bounds = array<i64: 2>, scalar_prefetch = 0 : i64, scratch_operands = 0 : i64, tpu.core_type = #tpu.core_type<tc>, window_params = [{transform_indices = @transform_0, window_bounds = array<i64: 16, 256>}, {pipeline_mode = #tpu.pipeline_mode<synchronous>, transform_indices = @transform_1, window_bounds = array<i64: 256, 64>}, {pipeline_mode = #tpu.pipeline_mode<synchronous>, transform_indices = @transform_2, window_bounds = array<i64: 3, 64, 64>}, {pipeline_mode = #tpu.pipeline_mode<synchronous>, transform_indices = @transform_3, window_bounds = array<i64: 64, 256>}, {pipeline_mode = #tpu.pipeline_mode<synchronous>, transform_indices = @transform_4, window_bounds = array<i64: 4, 64>}, {pipeline_mode = #tpu.pipeline_mode<synchronous>, transform_indices = @transform_5, window_bounds = array<i64: 2, 256>}, {transform_indices = @transform_6, window_bounds = array<i64: 16, 256>}]} {
    %c0 = arith.constant 0 : index
    %c0_0 = arith.constant 0 : index
    %0 = vector.load %arg1[%c0, %c0_0] : memref<16x256xf32, #tpu.memory_space<vmem>>, vector<16x256xf32>
    %1 = arith.truncf %0 : vector<16x256xf32> to vector<16x256xbf16>
    %c0_1 = arith.constant 0 : index
    %c0_2 = arith.constant 0 : index
    %2 = vector.load %arg2[%c0_1, %c0_2] : memref<256x64xbf16, #tpu.memory_space<vmem>>, vector<256x64xbf16>
    %cst = arith.constant dense<0.000000e+00> : vector<16x64xf32>
    %3 = tpu.matmul %1, %2, %cst {dimension_numbers = #tpu.dot_dimension_numbers<[1], [0], [0], [1], [0, 0, 1, 1], [], []>} : vector<16x256xbf16>, vector<256x64xbf16>, vector<16x64xf32> -> vector<16x64xf32>
    %c0_3 = arith.constant 0 : index
    %c0_4 = arith.constant 0 : index
    %4 = vector.load %arg5[%c0_3, %c0_4] : memref<4x64xf32, #tpu.memory_space<vmem>>, vector<1x64xf32>
    %5 = vector.broadcast %4 : vector<1x64xf32> to vector<16x64xf32>
    %6 = arith.mulf %3, %5 : vector<16x64xf32>
    %c1 = arith.constant 1 : index
    %c0_5 = arith.constant 0 : index
    %7 = vector.load %arg5[%c1, %c0_5] : memref<4x64xf32, #tpu.memory_space<vmem>>, vector<1x64xf32>
    %8 = vector.broadcast %7 : vector<1x64xf32> to vector<16x64xf32>
    %9 = arith.addf %6, %8 : vector<16x64xf32>
    %cst_6 = arith.constant 0.000000e+00 : f32
    %10 = vector.broadcast %cst_6 : f32 to vector<16x64xf32>
    %11 = arith.maximumf %9, %10 : vector<16x64xf32>
    %12 = tpu.iota {dimensions = array<i32: 0>} : vector<16x1xi32>
    %c16_i32 = arith.constant 16 : i32
    %c0_i32 = arith.constant 0 : i32
    %13 = arith.cmpi eq, %c16_i32, %c0_i32 : i32
    %c1_i32 = arith.constant 1 : i32
    %14 = arith.select %13, %c1_i32, %c16_i32 : i32
    %15 = vector.broadcast %14 : i32 to vector<16x1xi32>
    %16 = arith.remsi %12, %15 : vector<16x1xi32>
    %c0_i32_7 = arith.constant 0 : i32
    %17 = vector.broadcast %c0_i32_7 : i32 to vector<16x1xi32>
    %18 = arith.cmpi ne, %16, %17 : vector<16x1xi32>
    %c0_i32_8 = arith.constant 0 : i32
    %19 = vector.broadcast %c0_i32_8 : i32 to vector<16x1xi32>
    %20 = arith.cmpi slt, %16, %19 : vector<16x1xi32>
    %c0_i32_9 = arith.constant 0 : i32
    %21 = arith.cmpi slt, %14, %c0_i32_9 : i32
    %22 = vector.broadcast %21 : i1 to vector<16x1xi1>
    %23 = vector.broadcast %22 : vector<16x1xi1> to vector<16x1xi1>
    %24 = arith.xori %20, %23 : vector<16x1xi1>
    %25 = arith.andi %24, %18 : vector<16x1xi1>
    %26 = vector.broadcast %14 : i32 to vector<16x1xi32>
    %27 = arith.addi %16, %26 : vector<16x1xi32>
    %28 = arith.select %25, %27, %16 : vector<16x1xi1>, vector<16x1xi32>
    %c0_i32_10 = arith.constant 0 : i32
    %29 = vector.broadcast %c0_i32_10 : i32 to vector<16x1xi32>
    %30 = arith.cmpi sgt, %28, %29 : vector<16x1xi32>
    %c1_i32_11 = arith.constant 1 : i32
    %31 = tpu.dynamic_rotate %11 by %c1_i32_11 dim 0 : vector<16x64xf32>, i32 -> vector<16x64xf32>
    %cst_12 = arith.constant 0.000000e+00 : f32
    %32 = vector.shape_cast %30 : vector<16x1xi1> to vector<16x1xi1>
    %33 = vector.broadcast %32 : vector<16x1xi1> to vector<16x64xi1>
    %34 = vector.broadcast %cst_12 : f32 to vector<16x64xf32>
    %35 = arith.select %33, %31, %34 : vector<16x64xi1>, vector<16x64xf32>
    %c15_i32 = arith.constant 15 : i32
    %36 = vector.broadcast %c15_i32 : i32 to vector<16x1xi32>
    %37 = arith.cmpi slt, %28, %36 : vector<16x1xi32>
    %c15_i32_13 = arith.constant 15 : i32
    %38 = tpu.dynamic_rotate %11 by %c15_i32_13 dim 0 : vector<16x64xf32>, i32 -> vector<16x64xf32>
    %cst_14 = arith.constant 0.000000e+00 : f32
    %39 = vector.shape_cast %37 : vector<16x1xi1> to vector<16x1xi1>
    %40 = vector.broadcast %39 : vector<16x1xi1> to vector<16x64xi1>
    %41 = vector.broadcast %cst_14 : f32 to vector<16x64xf32>
    %42 = arith.select %40, %38, %41 : vector<16x64xi1>, vector<16x64xf32>
    %43 = arith.truncf %35 : vector<16x64xf32> to vector<16x64xbf16>
    %c0_15 = arith.constant 0 : index
    %c0_16 = arith.constant 0 : index
    %c0_17 = arith.constant 0 : index
    %44 = vector.load %arg3[%c0_15, %c0_16, %c0_17] : memref<3x64x64xbf16, #tpu.memory_space<vmem>>, vector<1x64x64xbf16>
    %45 = vector.shape_cast %44 : vector<1x64x64xbf16> to vector<64x64xbf16>
    %cst_18 = arith.constant dense<0.000000e+00> : vector<16x64xf32>
    %46 = tpu.matmul %43, %45, %cst_18 {dimension_numbers = #tpu.dot_dimension_numbers<[1], [0], [0], [1], [0, 0, 1, 1], [], []>} : vector<16x64xbf16>, vector<64x64xbf16>, vector<16x64xf32> -> vector<16x64xf32>
    %47 = arith.truncf %11 : vector<16x64xf32> to vector<16x64xbf16>
    %c1_19 = arith.constant 1 : index
    %c0_20 = arith.constant 0 : index
    %c0_21 = arith.constant 0 : index
    %48 = vector.load %arg3[%c1_19, %c0_20, %c0_21] : memref<3x64x64xbf16, #tpu.memory_space<vmem>>, vector<1x64x64xbf16>
    %49 = vector.shape_cast %48 : vector<1x64x64xbf16> to vector<64x64xbf16>
    %cst_22 = arith.constant dense<0.000000e+00> : vector<16x64xf32>
    %50 = tpu.matmul %47, %49, %cst_22 {dimension_numbers = #tpu.dot_dimension_numbers<[1], [0], [0], [1], [0, 0, 1, 1], [], []>} : vector<16x64xbf16>, vector<64x64xbf16>, vector<16x64xf32> -> vector<16x64xf32>
    %51 = arith.addf %46, %50 : vector<16x64xf32>
    %52 = arith.truncf %42 : vector<16x64xf32> to vector<16x64xbf16>
    %c2 = arith.constant 2 : index
    %c0_23 = arith.constant 0 : index
    %c0_24 = arith.constant 0 : index
    %53 = vector.load %arg3[%c2, %c0_23, %c0_24] : memref<3x64x64xbf16, #tpu.memory_space<vmem>>, vector<1x64x64xbf16>
    %54 = vector.shape_cast %53 : vector<1x64x64xbf16> to vector<64x64xbf16>
    %cst_25 = arith.constant dense<0.000000e+00> : vector<16x64xf32>
    %55 = tpu.matmul %52, %54, %cst_25 {dimension_numbers = #tpu.dot_dimension_numbers<[1], [0], [0], [1], [0, 0, 1, 1], [], []>} : vector<16x64xbf16>, vector<64x64xbf16>, vector<16x64xf32> -> vector<16x64xf32>
    %56 = arith.addf %51, %55 : vector<16x64xf32>
    %c2_26 = arith.constant 2 : index
    %c0_27 = arith.constant 0 : index
    %57 = vector.load %arg5[%c2_26, %c0_27] : memref<4x64xf32, #tpu.memory_space<vmem>>, vector<1x64xf32>
    %58 = vector.broadcast %57 : vector<1x64xf32> to vector<16x64xf32>
    %59 = arith.mulf %56, %58 : vector<16x64xf32>
    %c3 = arith.constant 3 : index
    %c0_28 = arith.constant 0 : index
    %60 = vector.load %arg5[%c3, %c0_28] : memref<4x64xf32, #tpu.memory_space<vmem>>, vector<1x64xf32>
    %61 = vector.broadcast %60 : vector<1x64xf32> to vector<16x64xf32>
    %62 = arith.addf %59, %61 : vector<16x64xf32>
    %cst_29 = arith.constant 0.000000e+00 : f32
    %63 = vector.broadcast %cst_29 : f32 to vector<16x64xf32>
    %64 = arith.maximumf %62, %63 : vector<16x64xf32>
    %65 = arith.truncf %64 : vector<16x64xf32> to vector<16x64xbf16>
    %c0_30 = arith.constant 0 : index
    %c0_31 = arith.constant 0 : index
    %66 = vector.load %arg4[%c0_30, %c0_31] : memref<64x256xbf16, #tpu.memory_space<vmem>>, vector<64x256xbf16>
    %cst_32 = arith.constant dense<0.000000e+00> : vector<16x256xf32>
    %67 = tpu.matmul %65, %66, %cst_32 {dimension_numbers = #tpu.dot_dimension_numbers<[1], [0], [0], [1], [0, 0, 1, 1], [], []>} : vector<16x64xbf16>, vector<64x256xbf16>, vector<16x256xf32> -> vector<16x256xf32>
    %c0_33 = arith.constant 0 : index
    %c0_34 = arith.constant 0 : index
    %68 = vector.load %arg6[%c0_33, %c0_34] : memref<2x256xf32, #tpu.memory_space<vmem>>, vector<1x256xf32>
    %69 = vector.broadcast %68 : vector<1x256xf32> to vector<16x256xf32>
    %70 = arith.mulf %67, %69 : vector<16x256xf32>
    %c1_35 = arith.constant 1 : index
    %c0_36 = arith.constant 0 : index
    %71 = vector.load %arg6[%c1_35, %c0_36] : memref<2x256xf32, #tpu.memory_space<vmem>>, vector<1x256xf32>
    %72 = vector.broadcast %71 : vector<1x256xf32> to vector<16x256xf32>
    %73 = arith.addf %70, %72 : vector<16x256xf32>
    %74 = arith.addf %73, %0 : vector<16x256xf32>
    %cst_37 = arith.constant 0.000000e+00 : f32
    %75 = vector.broadcast %cst_37 : f32 to vector<16x256xf32>
    %76 = arith.maximumf %74, %75 : vector<16x256xf32>
    %c0_38 = arith.constant 0 : index
    %c0_39 = arith.constant 0 : index
    %77 = vector.load %arg7[%c0_38, %c0_39] : memref<16x256xf32, #tpu.memory_space<vmem>>, vector<16x256xf32>
    tpu.vector_store %arg7[%c0_38, %c0_39], %76 {strides = array<i32>} : memref<16x256xf32, #tpu.memory_space<vmem>>, vector<16x256xf32>,
    return
  }
  func.func @transform_0(%arg0: i32) -> (i32, i32) {
    %c0_i32 = arith.constant 0 : i32
    %c0_i32_0 = arith.constant 0 : i32
    return %arg0, %c0_i32 : i32, i32
  }
  func.func @transform_1(%arg0: i32) -> (i32, i32) {
    %c0_i32 = arith.constant 0 : i32
    %c0_i32_0 = arith.constant 0 : i32
    %c0_i32_1 = arith.constant 0 : i32
    return %c0_i32, %c0_i32_0 : i32, i32
  }
  func.func @transform_2(%arg0: i32) -> (i32, i32, i32) {
    %c0_i32 = arith.constant 0 : i32
    %c0_i32_0 = arith.constant 0 : i32
    %c0_i32_1 = arith.constant 0 : i32
    %c0_i32_2 = arith.constant 0 : i32
    return %c0_i32, %c0_i32_0, %c0_i32_1 : i32, i32, i32
  }
  func.func @transform_3(%arg0: i32) -> (i32, i32) {
    %c0_i32 = arith.constant 0 : i32
    %c0_i32_0 = arith.constant 0 : i32
    %c0_i32_1 = arith.constant 0 : i32
    return %c0_i32, %c0_i32_0 : i32, i32
  }
  func.func @transform_4(%arg0: i32) -> (i32, i32) {
    %c0_i32 = arith.constant 0 : i32
    %c0_i32_0 = arith.constant 0 : i32
    %c0_i32_1 = arith.constant 0 : i32
    return %c0_i32, %c0_i32_0 : i32, i32
  }
  func.func @transform_5(%arg0: i32) -> (i32, i32) {
    %c0_i32 = arith.constant 0 : i32
    %c0_i32_0 = arith.constant 0 : i32
    %c0_i32_1 = arith.constant 0 : i32
    return %c0_i32, %c0_i32_0 : i32, i32
  }
  func.func @transform_6(%arg0: i32) -> (i32, i32) {
    %c0_i32 = arith.constant 0 : i32
    %c0_i32_0 = arith.constant 0 : i32
    return %arg0, %c0_i32 : i32, i32
  }
}

</mosaic_0001>

<bundles_post_ra>
// kernel: tpu_custom_call.1
= control target key start
LH: loop header
LB: loop body
LE: loop exit
PB: predicated region body
PF: predicated region fallthrough
CT: control target
= control target key end

     0   :  { %11 = vsyncpa [#allocation3], 0  ;;  %s1696_s0 = inlined_call_operand.vmem [shape: f32[32,256], index: 0, kind: input, shape index: {}]   ;;  %s1697_s1 = inlined_call_operand.vmem [shape: bf16[256,64], index: 1, kind: input, shape index: {}]   ;;  %s1698_s2 = inlined_call_operand.vmem [shape: bf16[3,64,64], index: 2, kind: input, shape index: {}]   ;;  %s1699_s3 = inlined_call_operand.hbm [shape: bf16[64,256], index: 3, kind: input, shape index: {}]   ;;  %s1700_s4 = inlined_call_operand.vmem [shape: f32[4,64], index: 4, kind: input, shape index: {}]   ;;  %s1701_s5 = inlined_call_operand.vmem [shape: f32[2,256], index: 5, kind: input, shape index: {}]   ;;  %s1702_s6 = inlined_call_operand.hbm [shape: f32[32,256], index: 6, kind: output, shape index: {}]  }
   0x1   :  { %12 = vsyncpa [#allocation4], 0 }
   0x2   :  { %14 = vsyncpa [#allocation4 + $0x1], 0  ;;  %s1395_s21 = smov 0   ;;  %s1397_s22 = smov 0  }
   0x3   :  { %s1399_s23 = smov 0   ;;  %s1401_s24 = smov 0  }
   0x4 LB: > { %s1416_s25 = sadd.s32 4294967295, %s1349_s24   ;;  %s997_s26 = sadd.s32 4294967294, %s1349_s24   ;;  %s1349_s24 = sphi %s1401_s24, %s1722_s24   ;;  %s1345_s23 = sphi %s1399_s23, %s1721_s23   ;;  %s1341_s22 = sphi %s1397_s22, %s1720_s22   ;;  %s1337_s21 = sphi %s1395_s21, %s1719_s21  }
   0x5   : > { %s1420_s27 = sadd.s32 1, %s1349_s24   ;;  %s158_s28 = sadd.s32 1, %s1345_s23 }
   0x6   : > { %s155_s29 = ssub.s32 %s1349_s24, %s1420_s27  ;;  %p168_p0 = scmp.ne.s32.totalorder %s1345_s23, %s1341_s22 }
   0x7   : > { %p156_p1 = scmp.eq.s32.totalorder %s155_s29, 0  ;;  %p169_p2 = scmp.eq.s32.totalorder %s1416_s25, 1 }
   0x8   : > { %p174_p3 = scmp.ne.s32.totalorder %s1341_s22, %s1337_s21  ;;  %p175_p4 = scmp.eq.s32.totalorder %s997_s26, 1 }
   0x9   : > { %s1431_s30 = scalar_select %p156_p1, %s1345_s23, %s158_s28  }
   0xa   : > { %p1433_p5 = por %p169_p2, %p168_p0  ;;  %p1437_p6 = por %p175_p4, %p174_p3 }
   0xb   : > { %p998_p7 = scmp.ge.s32.totalorder %s1349_s24, 1  ;;  %p182_p8 = scmp.lt.s32.totalorder %s1349_s24, 3 }
   0xc   : > { %s1706_s7 = scalar_select %p1433_p5, 1, 0 }
   0xd   : > { %s1707_s8 = scalar_select %p1437_p6, 1, 0 }
   0xe   : > { %p1703_p9 = scmp.eq.s32.totalorder %s1416_s25, 0  ;;  %p1444_p10 = pnand %p998_p7, %p182_p8 }
   0xf   : > { %s1351_s10 = smov [#allocation2]   ;;  %s1255_s15 = scalar_lea.hbm %s1699_s3, 1024 }
  0x10   : > { %s1708_s9 = scalar_select %p1444_p10, 1, 0 }
  0x11   : > { %s200_s11 = sshll.u32 %s1351_s10, 4  ;;  %p1164_p11 = pneg %p1444_p10  ;;  %s201_s11 = int_to_ptr.vmem [resolvable:$true] %s200_s11 }
  0x12   : > { %p1256_p13 = scmp.ne.s32.totalorder %s1699_s3, %s1255_s15  ;;  %p1262_p3 = scmp.lt.u32.totalorder %s1255_s15, %s1699_s3 }
  0x13   : > { %p1452_p12 = pnand %p1703_p9, %p1164_p11 }
  0x15   : > { %p1257_p0 = pneg %p1452_p12 }
  0x17   : > { %p1258_p1 = pnand %p1257_p0, %p1256_p13 }
  0x19   : > { %p1259_p2 = pneg %p1258_p1 }
  0x1b   : > { %p1264_p4 = pnand %p1262_p3, %p1259_p2 }
  0x1d   : > { %1267 = shalt.err (!%p1264_p4)
}
  0x1e   : > { %s1268_s20 = scalar_lea.vmem %s201_s11, 1024  ;;  %p1276_p9 = scmp.lt.s32.totalorder %s201_s11, %s201_s11 }
  0x1f   : > { %p1269_p7 = scmp.ne.s32.totalorder %s201_s11, %s1268_s20  ;;  %p1277_p6 = scmp.lt.s32.totalorder %s1268_s20, %s1268_s20 }
  0x21   : > { %p1271_p8 = pnand %p1269_p7, %p1257_p0  ;;  %p1278_p5 = por %p1277_p6, %p1276_p9 }
  0x23   : > { %p1272_p11 = pneg %p1271_p8 }
  0x25   : > { %p1279_p10 = pnand %p1278_p5, %p1272_p11 }
  0x27   : > { %1282 = shalt.err (!%p1279_p10)
}
  0x28   : > { %s1352_s26 = smov 128   ;;  %s1353_s28 = smov 8  }
  0x29   : > { %1167 = dma.hbm_to_vmem [thread:$0]  (!%p1452_p12), %s1699_s3, 1024, %s201_s11, [#allocation3], %s1352_s26, %s1352_s26, %s1353_s28  }
  0x2a   : > { %p1710_p13 = scmp.ne.s32.totalorder %s1708_s9, 0 }
  0x2b   : > { %p1711_p1 = scmp.eq.s32.totalorder (!%p1710_p13), %s1416_s25, 0 }
  0x2c   : > { %232 = sbr.rel (%p1710_p13) target bundleno = 802 (0x322), region = 44 }
  0x33   : > { %1328 = dma.done.wait (%p1711_p1), [#allocation3], 1024   ;;  %p1712_p0 = pmov %p1711_p1 }
  0x34   : > { %v1354_v0 = vmov 0.0   ;;  %s1004_s13 = sshll.u32 %s1416_s25, 1  ;;  %v1215_v1 = vld [vmem:[%s1697_s1 + $0x40] sm:$0xff]   ;;  %v1217_v3 = vld [vmem:[%s1697_s1 + $0x48] sm:$0xff]   ;;  %v1219_v5 = vld [vmem:[%s1697_s1 + $0x50] sm:$0xff]   ;;  %vm1355_vm0 = vmmov 0   ;;  %v463_v31 = vlaneseq }
  0x35   : > { %1330 = vsyncadd (%p1712_p0), [#allocation3], 4294966272  ;;  %1114 = vmatprep.subr.bf16.mxu1 %v1354_v0  ;;  %v1216_v2 = vld [vmem:[%s1697_s1] sm:$0xff]   ;;  %1077 = vmatprep.subr.bf16.mxu0 %v1215_v1  ;;  %p264_p5 = scmp.lt.s32.totalorder %s1004_s13, 3  ;;  %v1218_v4 = vld [vmem:[%s1697_s1 + $0x8] sm:$0xff]   ;;  %vm559_vm1 = vcmask 523264  }
  0x36   : > { %1078 = vmatpush3.bf16.msra.mxu0 %v1216_v2  ;;  %v1220_v6 = vld [vmem:[%s1697_s1 + $0x10] sm:$0xff]   ;;  %v1221_v7 = vld [vmem:[%s1697_s1 + $0x58] sm:$0xff]   ;;  %v1223_v9 = vld [vmem:[%s1697_s1 + $0x60] sm:$0xff]   ;;  %1122 = vmatprep.mubr.msk.bf16.mxu1 %vm1355_vm0, %v1354_v0  ;;  %v1561_v32 = vshrl.u32 %v463_v31, 7  ;;  %s1076_s15 = sshll.u32 %s1416_s25, 9  ;;  %p1717_p9 = scmp.ne.s32.totalorder %s1706_s7, 0 }
  0x37   : > { %1079 = vmatprep.subr.bf16.mxu0 %v1217_v3  ;;  %s1724_s13 = smov (!%p264_p5, %s1004_s13), 3  ;;  %v1222_v8 = vld [vmem:[%s1697_s1 + $0x18] sm:$0xff]   ;;  %v1224_v10 = vld [vmem:[%s1697_s1 + $0x20] sm:$0xff]   ;;  %v1225_v11 = vld [vmem:[%s1697_s1 + $0x68] sm:$0xff]   ;;  %s1651_s16 = scalar_lea.hbm %s1702_s6, %s1076_s15 }
  0x38   : > { %s1074_s14 = sshll.u32 %s1724_s13, 4  ;;  %v1226_v14 = vld [vmem:[%s1697_s1 + $0x28] sm:$0xff]   ;;  %v1227_v16 = vld [vmem:[%s1697_s1 + $0x70] sm:$0xff]   ;;  %v1231_v17 = vld [vmem:[%s1698_s2 + $0x20] sm:$0xff]   ;;  %v465_v40 = vadd.s32 8, %v1561_v32  ;;  %v470_v45 = vand.u32 15, %v1561_v32 }
  0x39   : > { %s268_s18 = scalar_lea.vmem %s1696_s0, %s1074_s14  ;;  %1115 = vmatpush3.bf16.msra.mxu1 %v1231_v17  ;;  %v1228_v18 = vld [vmem:[%s1697_s1 + $0x30] sm:$0xff]   ;;  %v1229_v19 = vld [vmem:[%s1697_s1 + $0x78] sm:$0xff]   ;;  %v1232_v24 = vld [vmem:[%s1698_s2 + $0x28] sm:$0xff]   ;;  %vm494_vm2 = vcmp.lt.s32.totalorder %v1561_v32, 1  ;;  %vm507_vm5 = vcmp.lt.s32.totalorder %v1561_v32, 7  ;;  %v867_v31 = vsub.s32 0, %v1561_v32 }
  0x3a   : > { %1080 = vmatpush3.bf16.msra.mxu0 %v1218_v4  ;;  %v1516_v12 = vld [vmem:[%s268_s18 + $0x8] sm:$0xff]  ;;  %v1518_v13 = vld [vmem:[%s268_s18 + $0x18] sm:$0xff]  ;;  %1116 = vmatprep.subr.bf16.mxu1 %v1354_v0  ;;  %v1541_v21 = vld [vmem:[%s268_s18] sm:$0xff]  ;;  %v477_v46 = vand.u32 15, %v465_v40  ;;  %vm1575_vm3 = vcmp.gt.s32.totalorder %v470_v45, 0  ;;  %s1357_s19 = smov [#allocation5]  }
  0x3b   : > { %1081 = vmatprep.subr.bf16.mxu0 %v1219_v5  ;;  %v277_v15 = vpack.c.bf16 %v1518_v13, %v1516_v12  ;;  %v1230_v20 = vld [vmem:[%s1697_s1 + $0x38] sm:$0xff]   ;;  %v1543_v22 = vld [vmem:[%s268_s18 + $0x10] sm:$0xff]  ;;  %v1243_v27 = vld [vmem:[#allocation2] ss:$8 sps:$4 sm:$0xff]   ;;  %s260_s18 = sand.u32 1, %s1341_s22   ;;  %s1287_s20 = sshll.u32 %s1357_s19, 4  ;;  %s1288_s20 = int_to_ptr.vmem [resolvable:$false] %s1287_s20 }
  0x3c   : > { %v276_v23 = vpack.c.bf16 %v1543_v22, %v1541_v21  ;;  %v1233_v25 = vld [vmem:[%s1698_s2 + $0x30] sm:$0xff]   ;;  %v1234_v26 = vld [vmem:[%s1698_s2 + $0x38] sm:$0xff]   ;;  %v1245_v28 = vld [vmem:[#allocation2 + $0x4] ss:$8 sps:$4 sm:$0xff]   ;;  %vm1579_vm4 = vcmp.lt.s32.totalorder %v477_v46, 15  ;;  %s1003_s10 = sshll.u32 %s260_s18, 5 }
  0x3d   : > { %438 = vmatprep.mubr.bf16.mxu0 %v277_v15  ;;  %1117 = vmatpush3.bf16.msra.mxu1 %v1232_v24  ;;  %v1248_v29 = vld [vmem:[#allocation2 + $0x14] ss:$8 sps:$4 sm:$0xff]   ;;  %v1246_v30 = vld [vmem:[#allocation2 + $0x10] ss:$8 sps:$4 sm:$0xff]   ;;  %v1023_v35 = vld [vmem:[%s1700_s4] ss:$0 sm:$0xff] }
  0x3e   : > { %1082 = vmatpush3.bf16.msra.mxu0 %v1220_v6  ;;  %1118 = vmatprep.subr.bf16.mxu1 %v1354_v0  ;;  %v1024_v38 = vld [vmem:[%s1700_s4 + $0x1] ss:$0 sm:$0xff]  ;;  %v1236_v62 = vld [vmem:[%s1698_s2 + $0x8] sm:$0xff]   ;;  %v1237_v4 = vld [vmem:[%s1698_s2 + $0x10] sm:$0xff]   ;;  %s262_s14 = scalar_lea.vmem [#allocation5], %s1003_s10  ;;  %s1655_s25 = scalar_lea.sflag [#allocation4], %s260_s18 }
  0x3f   : > { %1083 = vmatprep.subr.bf16.mxu0 %v1221_v7  ;;  %v1235_v51 = vld [vmem:[%s1698_s2] sm:$0xff]   ;;  %v1238_v5 = vld [vmem:[%s1698_s2 + $0x18] sm:$0xff]   ;;  %v1240_v7 = vld [vmem:[%s1698_s2 + $0x48] sm:$0xff]   ;;  %s923_s12 = sshll.u32 %s262_s14, 4  ;;  %s1289_s13 = scalar_lea.vmem %s1288_s20, 1024  ;;  %s1646_s12 = int_to_ptr.vmem [resolvable:$true] %s923_s12 }
  0x40   : > { %v1239_v6 = vld [vmem:[%s1698_s2 + $0x40] sm:$0xff]   ;;  %v1252_v15 = vld [vmem:[#allocation2 + $0x30] ss:$8 sps:$4 sm:$0xff]   ;;  %s1283_s17 = scalar_lea.vmem %s1646_s12, 512  ;;  %p1290_p2 = scmp.lt.s32.totalorder %s1646_s12, %s1288_s20 }
  0x41   : > { %1119 = vmatpush3.bf16.msra.mxu1 %v1233_v25  ;;  %v1056_v17 = vld [vmem:[%s1700_s4 + $0x2] ss:$0 sm:$0xff]  ;;  %p1284_p6 = scmp.ne.s32.totalorder %s1646_s12, %s1283_s17  ;;  %p1291_p3 = scmp.lt.s32.totalorder %s1289_s13, %s1283_s17 }
  0x42   : > { %1084 = vmatpush3.bf16.msra.mxu0 %v1222_v8  ;;  %1120 = vmatprep.subr.bf16.mxu1 %v1354_v0  ;;  %v1241_v8 = vld [vmem:[%s1698_s2 + $0x50] sm:$0xff]  }
  0x43   : > { %1085 = vmatprep.subr.bf16.mxu0 %v1223_v9  ;;  %v1242_v9 = vld [vmem:[%s1698_s2 + $0x58] sm:$0xff]   ;;  %p1285_p10 = pnand %p1284_p6, %p1717_p9  ;;  %p1292_p4 = por %p1291_p3, %p1290_p2 }
  0x45   : > { %1121 = vmatpush3.bf16.msra.mxu1 %v1234_v26  ;;  %p1286_p12 = pneg %p1285_p10 }
  0x46   : > { %1086 = vmatpush3.bf16.msra.mxu0 %v1224_v10  ;;  %1126 = vmatprep.subr.bf16.mxu1 %v1354_v0  ;;  %v1251_v10 = vld [vmem:[#allocation2 + $0x24] ss:$8 sps:$4 sm:$0xff]  }
  0x47   : > { %1087 = vmatprep.subr.bf16.mxu0 %v1225_v11  ;;  %v1249_v11 = vld [vmem:[#allocation2 + $0x20] ss:$8 sps:$4 sm:$0xff]   ;;  %p1293_p7 = pnand %p1292_p4, %p1286_p12 }
  0x4a   : > { %1088 = vmatpush3.bf16.msra.mxu0 %v1226_v14  ;;  %v1254_v14 = vld [vmem:[#allocation2 + $0x34] ss:$8 sps:$4 sm:$0xff]  }
  0x4b   : > { %1089 = vmatprep.subr.bf16.mxu0 %v1227_v16  ;;  %v1356_v16 = vmov 0  }
  0x4e   : > { %1090 = vmatpush3.bf16.msra.mxu0 %v1228_v18 }
  0x4f   : > { %1091 = vmatprep.subr.bf16.mxu0 %v1229_v19 }
  0x52   : > { %1092 = vmatpush3.bf16.msra.mxu0 %v1230_v20 }
  0x53   : > { %820 = vmatprep.subr.bf16.mxu0 %v1245_v28 }
  0x55   : > { %439 = vmatmul.mubr.bf16.vlgmr.msra.gmra.mrb[0].mxu0 %v276_v23 }
  0x56   : > { %821 = vmatpush1.bf16.msra.mxu0 %v1243_v27  ;;  %852 = vmatprep.mubr.bf16.mxu0 %v1356_v16 }
  0x57   : > { %822 = vmatprep.subr.bf16.mxu0 %v1248_v29 }
  0x5a   : > { %823 = vmatpush1.bf16.msra.mxu0 %v1246_v30 }
  0x5b   : > { %824 = vmatprep.subr.bf16.mxu0 %v1251_v10 }
  0x5e   : > { %825 = vmatpush1.bf16.msra.mxu0 %v1249_v11 }
  0x5f   : > { %826 = vmatprep.subr.bf16.mxu0 %v1254_v14 }
  0x62   : > { %827 = vmatpush1.bf16.msra.mxu0 %v1252_v15 }
 0x128   : > { %v1093_v33 = vpop.f32.mrb[0].mxu0 }
 0x129   : > { %v1094_v34 = vpop.f32.mrb[1].mxu0 }
 0x12a   : > { %v1095_v36 = vadd.f32 %v1094_v34, %v1093_v33  ;;  %v1096_v37 = vpop.f32.mrb[2].mxu0  ;;  %v863_v33 = vld [vmem:[%s1701_s5] ss:$2 sm:$0x3]  ;;  %v871_v34 = vsub.s32 1, %v1561_v32 }
 0x12b   : > { %v1097_v39 = vpop.f32.mrb[3].mxu0 }
 0x12c   : > { %v452_v41 = vmul.f32 %v1095_v36, %v1023_v35  ;;  %v1098_v42 = vadd.f32 %v1097_v39, %v1096_v37  ;;  %v868_v36 = vrot.slane %v863_v33, %v867_v31  ;;  %v872_v37 = vrot.slane %v863_v33, %v871_v34 }
 0x12e   : > { %v459_v43 = vadd.f32 %v1024_v38, %v452_v41  ;;  %v453_v44 = vmul.f32 %v1098_v42, %v1023_v35  ;;  %v1067_v35 = vld [vmem:[%s1701_s5 + $0x1] ss:$2 sm:$0x3] }
 0x12f   : > { %v889_v40 = vrot.slane %v1067_v35, %v871_v34 }
 0x130   : > { %v461_v47 = vmax.f32 %v459_v43, 0.0  ;;  %v460_v48 = vadd.f32 %v1024_v38, %v453_v44  ;;  %v885_v38 = vrot.slane %v1067_v35, %v867_v31 }
 0x132   : > { %v462_v49 = vmax.f32 %v460_v48, 0.0  ;;  %v492_v50 = vrot.slane %v461_v47, 7  ;;  %v505_v54 = vrot.slane %v461_v47, 1 }
 0x134   : > { %v493_v55 = vrot.slane %v462_v49, 7  ;;  %v506_v56 = vrot.slane %v462_v49, 1  ;;  %v525_v57 = vpack.c.bf16 %v462_v49, %v461_v47 }
 0x136   : > { %1123 = vmatmul.mubr.msk.bf16.vlgmr.msra.gmra.mrb[0].mxu1 %vm559_vm1, %v525_v57  ;;  %v495_v58 = vsel %vm494_vm2, %v492_v50, %v493_v55  ;;  %v496_v59 = vsel %vm494_vm2, %v493_v55, %v492_v50  ;;  %v508_v60 = vsel %vm507_vm5, %v505_v54, %v506_v56  ;;  %v509_v61 = vsel %vm507_vm5, %v506_v56, %v505_v54 }
 0x137   : > { %1127 = vmatpush3.bf16.msra.mxu1 %v1235_v51  ;;  %1134 = vmatprep.mubr.msk.bf16.mxu1 %vm1355_vm0, %v1354_v0  ;;  %v501_v63 = vsel %vm1575_vm3, %v496_v59, 0.0  ;;  %v515_v1 = vsel %vm1579_vm4, %v509_v61, 0.0 }
 0x138   : > { %1128 = vmatprep.subr.bf16.mxu1 %v1354_v0  ;;  %v516_v2 = vpack.c.bf16 %v495_v58, %v501_v63  ;;  %v672_v3 = vpack.c.bf16 %v515_v1, %v508_v60 }
 0x13b   : > { %1129 = vmatpush3.bf16.msra.mxu1 %v1236_v62 }
 0x13c   : > { %1130 = vmatprep.subr.bf16.mxu1 %v1354_v0 }
 0x13f   : > { %1131 = vmatpush3.bf16.msra.mxu1 %v1237_v4 }
 0x140   : > { %1132 = vmatprep.subr.bf16.mxu1 %v1354_v0 }
 0x143   : > { %1133 = vmatpush3.bf16.msra.mxu1 %v1238_v5 }
 0x144   : > { %1138 = vmatprep.subr.bf16.mxu1 %v1354_v0 }
 0x146   : > { %1135 = vmatmul.mubr.msk.bf16.vlgmr.msra.gmra.mrb[0].mxu1 %vm559_vm1, %v516_v2 }
 0x147   : > { %1139 = vmatpush3.bf16.msra.mxu1 %v1239_v6  ;;  %1146 = vmatprep.mubr.msk.bf16.mxu1 %vm1355_vm0, %v1354_v0 }
 0x148   : > { %1140 = vmatprep.subr.bf16.mxu1 %v1354_v0 }
 0x14b   : > { %1141 = vmatpush3.bf16.msra.mxu1 %v1240_v7 }
 0x14c   : > { %1142 = vmatprep.subr.bf16.mxu1 %v1354_v0 }
 0x14f   : > { %1143 = vmatpush3.bf16.msra.mxu1 %v1241_v8 }
 0x150   : > { %1144 = vmatprep.subr.bf16.mxu1 %v1354_v0  ;;  %v1057_v0 = vld [vmem:[%s1700_s4 + $0x3] ss:$0 sm:$0xff] }
 0x153   : > { %1145 = vmatpush3.bf16.msra.mxu1 %v1242_v9 }
 0x156   : > { %1147 = vmatmul.mubr.msk.bf16.vlgmr.msra.gmra.mrb[0].mxu1 %vm559_vm1, %v672_v3 }
 0x229   : > { %v743_v18 = vpop.f32.mrb[0].mxu1 }
 0x22a   : > { %v757_v19 = vmul.f32 %v1056_v17, %v743_v18  ;;  %v1148_v20 = vpop.f32.mrb[1].mxu1 }
 0x22b   : > { %v746_v23 = vpop.f32.mrb[2].mxu1 }
 0x22c   : > { %v764_v24 = vadd.f32 %v1057_v0, %v757_v19  ;;  %v758_v25 = vmul.f32 %v1056_v17, %v746_v23  ;;  %v1149_v26 = vpop.f32.mrb[3].mxu1 }
 0x22e   : > { %v765_v27 = vadd.f32 %v1057_v0, %v758_v25  ;;  %v766_v28 = vmax.f32 %v764_v24, 0.0 }
 0x230   : > { %v767_v29 = vmax.f32 %v765_v27, 0.0 }
 0x232   : > { %v768_v30 = vpack.c.bf16 %v767_v29, %v766_v28 }
 0x234   : > { %1066 = vmatmul.mubr.msk.bf16.vlgmr.msra.gmra.mrb[4].mxu0 %vm559_vm1, %v768_v30 }
 0x307   : > { %v854_v39 = vpop.f32.mrb[4].mxu0 }
 0x308   : > { %v875_v41 = vmul.f32 %v868_v36, %v854_v39  ;;  %v856_v42 = vpop.f32.mrb[5].mxu0 }
 0x309   : > { %v876_v43 = vmul.f32 %v872_v37, %v856_v42  ;;  %v858_v44 = vpop.f32.mrb[6].mxu0 }
 0x30a   : > { %v892_v45 = vadd.f32 %v885_v38, %v875_v41  ;;  %v877_v46 = vmul.f32 %v868_v36, %v858_v44  ;;  %v860_v32 = vpop.f32.mrb[7].mxu0 }
 0x30b   : > { %v893_v47 = vadd.f32 %v889_v40, %v876_v43  ;;  %v878_v48 = vmul.f32 %v872_v37, %v860_v32 }
 0x30c   : > { %v896_v49 = vadd.f32 %v892_v45, %v1541_v21  ;;  %v894_v50 = vadd.f32 %v885_v38, %v877_v46 }
 0x30d   : > { %v897_v51 = vadd.f32 %v893_v47, %v1516_v12  ;;  %v895_v52 = vadd.f32 %v889_v40, %v878_v48 }
 0x30e   : > { %v900_v53 = vmax.f32 %v896_v49, 0.0  ;;  %v898_v54 = vadd.f32 %v894_v50, %v1543_v22 }
 0x30f   : > { %v901_v55 = vmax.f32 %v897_v51, 0.0  ;;  %v899_v56 = vadd.f32 %v895_v52, %v1518_v13 }
 0x310   : > { %904 = vst [vmem:[%s262_s14] sm:$0xff] %v900_v53  ;;  %v902_v21 = vmax.f32 %v898_v54, 0.0 }
 0x311   : > { %905 = vst [vmem:[%s262_s14 + $0x8] sm:$0xff] %v901_v55  ;;  %v903_v12 = vmax.f32 %v899_v56, 0.0 }
 0x312   : > { %906 = vst [vmem:[%s262_s14 + $0x10] sm:$0xff] %v902_v21 }
 0x313   : > { %907 = vst [vmem:[%s262_s14 + $0x18] sm:$0xff] %v903_v12 }
 0x314   : > { %1296 = shalt.err (!%p1293_p7)
}
 0x315   : > { %s1297_s26 = scalar_lea.hbm %s1651_s16, 512  ;;  %s1301_s18 = scalar_lea.hbm %s1702_s6, 1024 }
 0x316   : > { %p1298_p8 = scmp.ne.s32.totalorder %s1651_s16, %s1297_s26  ;;  %p1302_p1 = scmp.lt.u32.totalorder %s1651_s16, %s1702_s6 }
 0x317   : > { %p1303_p0 = scmp.lt.u32.totalorder %s1301_s18, %s1297_s26  ;;  %p1305_p6 = scmp.lt.u32.totalorder %s1297_s26, %s1651_s16 }
 0x318   : > { %p1299_p11 = pnand %p1298_p8, %p1717_p9 }
 0x319   : > { %p1304_p5 = por %p1303_p0, %p1302_p1 }
 0x31a   : > { %p1300_p13 = pneg %p1299_p11 }
 0x31b   : > { %p1306_p10 = por %p1305_p6, %p1304_p5 }
 0x31d   : > { %p1307_p12 = pnand %p1306_p10, %p1300_p13 }
 0x31f   : > { %1310 = shalt.err (!%p1307_p12)
}
 0x320   : > { %s1358_s15 = smov 256   ;;  %s1359_s11 = smov 16  }
 0x321   : > { %1162 = dma.vmem_to_hbm [thread:$0]  (%p1717_p9), %s1646_s12, 512, %s1651_s16, %s1655_s25, %s1358_s15, %s1358_s15, %s1359_s11  }
 0x322 PF: > { %p1174_p2 = scmp.ge.s32.totalorder %s1349_s24, 2  ;;  %s938_s9 = sand.u32 1, %s1337_s21  }
 0x323   : > { %p1718_p3 = scmp.ne.s32.totalorder %s1707_s8, 0  ;;  %s939_s17 = scalar_lea.sflag [#allocation4], %s938_s9 }
 0x325   : > { %p1169_p4 = pnand %p1174_p2, %p1718_p3 }
 0x327   : > { %1332 = dma.done.wait (!%p1169_p4), %s939_s17, 512  }
 0x328   : > { %1334 = vsyncadd (!%p1169_p4), %s939_s17, 4294966784  ;;  %p17_p7 = scmp.ge.s32.totalorder %s1420_s27, 4   ;;  %s1719_s21 = smov %s1341_s22 }
 0x329   : > { %s1720_s22 = smov %s1345_s23  ;;  %s1721_s23 = smov %s1431_s30 }
 0x32a   : > { %s1722_s24 = smov %s1420_s27  ;;  %19 = sbr.rel (!%p17_p7) target bundleno = 4 (0x4), region = 87 }
 0x331   :  { %944 = vsyncpa [#allocation3], 1 }
 0x332   :  { %946 = vsyncpa [#allocation3 + $0x1], 1 }
 0x333   :  { %947 = vsyncpa [#allocation4], 1 }
 0x334   :  { %949 = vsyncpa [#allocation4 + $0x1], 1 }

</bundles_post_ra>
